<compile_context>
chip_gen: v7x
topology: tpu7x:2x2x1
jax: 0.10.0
libtpu: 0.0.40
codegen_flags: <defaults>
</compile_context>

<pallas_src>
import functools
import math

import jax
import jax.numpy as jnp
import numpy as np
from jax.experimental import pallas as pl
from jax.experimental.pallas import tpu as pltpu


# ----------------------------- in-kernel helpers -----------------------------

def _layer_norm(x, gamma, beta, eps=1e-5):
    # x: (M, C), gamma/beta: (1, C).  Matches torch.nn.LayerNorm (biased var).
    mu = jnp.mean(x, axis=-1, keepdims=True)
    var = jnp.mean((x - mu) ** 2, axis=-1, keepdims=True)
    return (x - mu) * jax.lax.rsqrt(var + eps) * gamma + beta


def _erf(x):
    # Abramowitz & Stegun 7.1.26 rational approximation (|err| < 1.5e-7).
    # The divide goes to the EUP via pl.reciprocal(approx=True).
    a1, a2, a3, a4, a5 = (0.254829592, -0.284496736, 1.421413741,
                          -1.453152027, 1.061405429)
    p = 0.3275911
    sgn = jnp.where(x >= 0.0, 1.0, -1.0)
    ax = jnp.abs(x)
    t = pl.reciprocal(1.0 + p * ax, approx=True)
    poly = ((((a5 * t + a4) * t + a3) * t + a2) * t + a1) * t
    return sgn * (1.0 - poly * jnp.exp(-ax * ax))


def _gelu_exact(x):
    # torch.nn.GELU() default (approximate='none'): 0.5*x*(1 + erf(x/sqrt(2)))
    return 0.5 * x * (1.0 + _erf(x * 0.7071067811865476))


# --------------------------------- kernel ------------------------------------

def block_kernel(x_ref, mask_ref,
                 pre_g_ref, pre_b_ref,
                 wqkv_ref, bqkv_ref,
                 wproj_ref, bproj_ref,
                 post_g_ref, post_b_ref,
                 w1_ref, b1_ref, w2_ref, b2_ref,
                 o_ref, *, n_head, n_embed):
    C, H = n_embed, n_head
    x = x_ref[...]          # (Mt, C): Bt sequences stacked along the row axis
    mask = mask_ref[...]    # (Mt, Mt): additive block-diag causal bias (0 / -1e30)

    # ---- pre-norm ---------------------------------------------------------
    xn = _layer_norm(x, pre_g_ref[...], pre_b_ref[...])

    # ---- fused QKV projection (single lane-dense matmul) -------------------
    # Q columns/biases were pre-scaled by 1/sqrt(C) in the wrapper.
    qkv = jnp.dot(xn, wqkv_ref[...], preferred_element_type=jnp.float32) \
        + bqkv_ref[...]

    # ---- multi-head attention (each head is full-width n_embed) ------------
    attn = None
    for h in range(H):
        base = 3 * h * C
        q = qkv[:, base:base + C]
        k = qkv[:, base + C:base + 2 * C]
        v = qkv[:, base + 2 * C:base + 3 * C]

        # scores = q @ k^T without materializing a transpose
        s = jax.lax.dot_general(q, k, (((1,), (1,)), ((), ())),
                                preferred_element_type=jnp.float32)
        s = s + mask                                    # causal + cross-seq mask
        s = s - jnp.max(s, axis=-1, keepdims=True)      # every row has >=1 unmasked
        e = jnp.exp(s)
        probs = e * pl.reciprocal(jnp.sum(e, axis=-1, keepdims=True), approx=True)
        # (attention-score dropout is identity in eval mode)

        head = jnp.dot(probs, v, preferred_element_type=jnp.float32)
        # output projection: per-head accumulation (no lane-axis concat)
        contrib = jnp.dot(head, wproj_ref[h], preferred_element_type=jnp.float32)
        attn = contrib if attn is None else attn + contrib
    mha = attn + bproj_ref[...]

    # ---- residual + post-norm (residuals use the *normalized* tensors,
    #      exactly as in the reference Block.forward) ------------------------
    mlp_in = _layer_norm(mha + xn, post_g_ref[...], post_b_ref[...])

    # ---- MLP (c_fc -> exact GELU -> c_proj), residual -----------------------
    h1 = jnp.dot(mlp_in, w1_ref[...], preferred_element_type=jnp.float32) + b1_ref[...]
    h1 = _gelu_exact(h1)
    h2 = jnp.dot(h1, w2_ref[...], preferred_element_type=jnp.float32) + b2_ref[...]

    o_ref[...] = h2 + mlp_in


# --------------------------------- wrapper -----------------------------------

def transformer_block(x, params, *, rows_target=256):
    B, T, C = x.shape
    H = params["wq"].shape[0]

    # Pick a batch tile: a divisor Bt of B such that the (Bt*T, C) block is
    # legal (row count multiple of 8, or the full array) and as large as
    # possible without exceeding rows_target rows per grid step.
    divisors = [d for d in range(1, B + 1) if B % d == 0]
    valid = [d for d in divisors if d == B or (d * T) % 8 == 0]
    cands = [d for d in valid if d * T <= rows_target] or [min(valid)]
    Bt = max(cands)
    Mt = Bt * T
    n_blocks = B // Bt   # NOTE: on v7x keep this >= 2 when possible (2 TCs/chip)

    # --- fuse per-head QKV weights into one (C, 3*H*C) matmul and fold the
    #     1/sqrt(C) attention scale into the Q columns/biases.
    scale = 1.0 / math.sqrt(C)
    w_parts, b_parts = [], []
    for h in range(H):
        w_parts += [params["wq"][h] * scale, params["wk"][h], params["wv"][h]]
        b_parts += [params["bq"][h] * scale, params["bk"][h], params["bv"][h]]
    w_qkv = jnp.concatenate(w_parts, axis=1)            # (C, 3*H*C)
    b_qkv = jnp.concatenate(b_parts, axis=1)            # (1, 3*H*C)
    w_proj = params["wproj"].reshape(H, C, C)           # per-head output proj

    # --- precomputed block-diagonal causal additive mask over Bt stacked
    #     sequences (finite -1e30, so no inf-inf NaN risk).
    r = np.arange(Mt)
    keep = (r[:, None] // T == r[None, :] // T) & (r[:, None] >= r[None, :])
    mask_bias = jnp.asarray(np.where(keep, 0.0, -1e30), dtype=jnp.float32)

    x2d = x.reshape(B * T, C)

    def full(arr):
        ndim = arr.ndim
        return pl.BlockSpec(arr.shape, lambda b, _n=ndim: (0,) * _n)

    weights = [mask_bias,
               params["pre_g"], params["pre_b"],
               w_qkv, b_qkv, w_proj, params["bproj"],
               params["post_g"], params["post_b"],
               params["w1"], params["b1"], params["w2"], params["b2"]]

    in_specs = [pl.BlockSpec((Mt, C), lambda b: (b, 0))] + [full(w) for w in weights]

    kernel = functools.partial(block_kernel, n_head=H, n_embed=C)

    out2d = pl.pallas_call(
        kernel,
        out_shape=jax.ShapeDtypeStruct((B * T, C), jnp.float32),
        grid_spec=pltpu.PrefetchScalarGridSpec(
            num_scalar_prefetch=0,
            grid=(n_blocks,),
            in_specs=in_specs,
            out_specs=pl.BlockSpec((Mt, C), lambda b: (b, 0)),
        ),
        compiler_params=pltpu.CompilerParams(
            dimension_semantics=("parallel",)),
    )(x2d, *weights)

    return out2d.reshape(B, T, C)


# --------------------------- pure-JAX reference -------------------------------

def block_reference(x, params):
    """Direct transcription of the PyTorch Block.forward (eval mode)."""
    B, T, C = x.shape
    H = params["wq"].shape[0]

    def ln(v, g, b, eps=1e-5):
        mu = v.mean(-1, keepdims=True)
        var = ((v - mu) ** 2).mean(-1, keepdims=True)
        return (v - mu) / jnp.sqrt(var + eps) * g + b

    xn = ln(x, params["pre_g"], params["pre_b"])
    causal = np.tril(np.ones((T, T), dtype=bool))
    heads = []
    for h in range(H):
        q = xn @ params["wq"][h] + params["bq"][h]
        k = xn @ params["wk"][h] + params["bk"][h]
        v = xn @ params["wv"][h] + params["bv"][h]
        s = jnp.einsum("btc,bsc->bts", q, k) / math.sqrt(C)
        s = jnp.where(causal[None], s, -1e30)
        p = jax.nn.softmax(s, axis=-1)
        heads.append(jnp.einsum("bts,bsc->btc", p, v))
    mha = jnp.concatenate(heads, axis=-1) @ params["wproj"] + params["bproj"]
    mlp_in = ln(mha + xn, params["post_g"], params["post_b"])
    h1 = jax.nn.gelu(mlp_in @ params["w1"] + params["b1"], approximate=False)
    h2 = h1 @ params["w2"] + params["b2"]
    return h2 + mlp_in


# ------------------------------- param setup ----------------------------------

def init_params(key, n_embed, n_head):
    ks = jax.random.split(key, 16)
    C, H = n_embed, n_head
    std = 0.02
    # Linear weights stored as (in, out) so the kernel does x @ W + b
    return {
        "pre_g":  1.0 + 0.1 * jax.random.normal(ks[12], (1, C), jnp.float32),
        "pre_b":  0.02 * jax.random.normal(ks[13], (1, C), jnp.float32),
        "wq":     std * jax.random.normal(ks[0], (H, C, C), jnp.float32),
        "bq":     0.01 * jax.random.normal(ks[1], (H, 1, C), jnp.float32),
        "wk":     std * jax.random.normal(ks[2], (H, C, C), jnp.float32),
        "bk":     0.01 * jax.random.normal(ks[3], (H, 1, C), jnp.float32),
        "wv":     std * jax.random.normal(ks[4], (H, C, C), jnp.float32),
        "bv":     0.01 * jax.random.normal(ks[5], (H, 1, C), jnp.float32),
        "wproj":  std * jax.random.normal(ks[6], (H * C, C), jnp.float32),
        "bproj":  0.01 * jax.random.normal(ks[7], (1, C), jnp.float32),
        "post_g": 1.0 + 0.1 * jax.random.normal(ks[14], (1, C), jnp.float32),
        "post_b": 0.02 * jax.random.normal(ks[15], (1, C), jnp.float32),
        "w1":     std * jax.random.normal(ks[8], (C, 4 * C), jnp.float32),
        "b1":     0.01 * jax.random.normal(ks[9], (1, 4 * C), jnp.float32),
        "w2":     std * jax.random.normal(ks[10], (4 * C, C), jnp.float32),
        "b2":     0.01 * jax.random.normal(ks[11], (1, C), jnp.float32),
    }


if __name__ == "__main__":
    # config: n_embed=32, n_head=2, block_size(seq)=8, dropout=0.0, bias=True
    B, T, C, H = 2, 8, 32, 2

    key = jax.random.PRNGKey(0)
    k_x, k_p = jax.random.split(key)
    x = jax.random.normal(k_x, (B, T, C), jnp.float32)
    params = init_params(k_p, C, H)

    out = transformer_block(x, params)
    out = jax.block_until_ready(out)

    assert out.shape == (B, T, C) and out.dtype == jnp.float32
    assert bool(jnp.all(jnp.isfinite(out)))

    # Correctness vs. a pure-JAX transcription of the PyTorch forward
    # (loose tolerance covers the approx reciprocal / A&S-erf in the kernel).
    ref = jax.block_until_ready(block_reference(x, params))
    err = float(jnp.max(jnp.abs(out - ref)))
    assert err < 2e-2, f"max abs error vs reference: {err}"

    print("KERNEL_OK")
</pallas_src>

<mosaic_0001>
module attributes {stable_mosaic.version = 11 : i64} {
  func.func @block_kernel(%arg0: i32, %arg1: memref<16x32xf32, #tpu.memory_space<vmem>>, %arg2: memref<16x16xf32, #tpu.memory_space<vmem>>, %arg3: memref<1x32xf32, #tpu.memory_space<vmem>>, %arg4: memref<1x32xf32, #tpu.memory_space<vmem>>, %arg5: memref<32x192xf32, #tpu.memory_space<vmem>>, %arg6: memref<1x192xf32, #tpu.memory_space<vmem>>, %arg7: memref<2x32x32xf32, #tpu.memory_space<vmem>>, %arg8: memref<1x32xf32, #tpu.memory_space<vmem>>, %arg9: memref<1x32xf32, #tpu.memory_space<vmem>>, %arg10: memref<1x32xf32, #tpu.memory_space<vmem>>, %arg11: memref<32x128xf32, #tpu.memory_space<vmem>>, %arg12: memref<1x128xf32, #tpu.memory_space<vmem>>, %arg13: memref<128x32xf32, #tpu.memory_space<vmem>>, %arg14: memref<1x32xf32, #tpu.memory_space<vmem>>, %arg15: memref<16x32xf32, #tpu.memory_space<vmem>>) attributes {dimension_semantics = [#tpu.dimension_semantics<parallel>], iteration_bounds = array<i64: 1>, scalar_prefetch = 0 : i64, scratch_operands = 0 : i64, tpu.core_type = #tpu.core_type<tc>, window_params = [{transform_indices = @transform_0, window_bounds = array<i64: 16, 32>}, {pipeline_mode = #tpu.pipeline_mode<synchronous>, transform_indices = @transform_1, window_bounds = array<i64: 16, 16>}, {pipeline_mode = #tpu.pipeline_mode<synchronous>, transform_indices = @transform_2, window_bounds = array<i64: 1, 32>}, {pipeline_mode = #tpu.pipeline_mode<synchronous>, transform_indices = @transform_3, window_bounds = array<i64: 1, 32>}, {pipeline_mode = #tpu.pipeline_mode<synchronous>, transform_indices = @transform_4, window_bounds = array<i64: 32, 192>}, {pipeline_mode = #tpu.pipeline_mode<synchronous>, transform_indices = @transform_5, window_bounds = array<i64: 1, 192>}, {pipeline_mode = #tpu.pipeline_mode<synchronous>, transform_indices = @transform_6, window_bounds = array<i64: 2, 32, 32>}, {pipeline_mode = #tpu.pipeline_mode<synchronous>, transform_indices = @transform_7, window_bounds = array<i64: 1, 32>}, {pipeline_mode = #tpu.pipeline_mode<synchronous>, transform_indices = @transform_8, window_bounds = array<i64: 1, 32>}, {pipeline_mode = #tpu.pipeline_mode<synchronous>, transform_indices = @transform_9, window_bounds = array<i64: 1, 32>}, {pipeline_mode = #tpu.pipeline_mode<synchronous>, transform_indices = @transform_10, window_bounds = array<i64: 32, 128>}, {pipeline_mode = #tpu.pipeline_mode<synchronous>, transform_indices = @transform_11, window_bounds = array<i64: 1, 128>}, {pipeline_mode = #tpu.pipeline_mode<synchronous>, transform_indices = @transform_12, window_bounds = array<i64: 128, 32>}, {pipeline_mode = #tpu.pipeline_mode<synchronous>, transform_indices = @transform_13, window_bounds = array<i64: 1, 32>}, {transform_indices = @transform_14, window_bounds = array<i64: 16, 32>}]} {
    %c0 = arith.constant 0 : index
    %c0_0 = arith.constant 0 : index
    %0 = vector.load %arg1[%c0, %c0_0] : memref<16x32xf32, #tpu.memory_space<vmem>>, vector<16x32xf32>
    %c0_1 = arith.constant 0 : index
    %c0_2 = arith.constant 0 : index
    %1 = vector.load %arg2[%c0_1, %c0_2] : memref<16x16xf32, #tpu.memory_space<vmem>>, vector<16x16xf32>
    %c0_3 = arith.constant 0 : index
    %c0_4 = arith.constant 0 : index
    %2 = vector.load %arg3[%c0_3, %c0_4] : memref<1x32xf32, #tpu.memory_space<vmem>>, vector<1x32xf32>
    %c0_5 = arith.constant 0 : index
    %c0_6 = arith.constant 0 : index
    %3 = vector.load %arg4[%c0_5, %c0_6] : memref<1x32xf32, #tpu.memory_space<vmem>>, vector<1x32xf32>
    %cst = arith.constant dense<0.000000e+00> : vector<16xf32>
    %4 = vector.multi_reduction <add>, %0, %cst [1] : vector<16x32xf32> to vector<16xf32>
    %5 = vector.shape_cast %4 : vector<16xf32> to vector<16x1xf32>
    %cst_7 = arith.constant 3.200000e+01 : f32
    %6 = vector.broadcast %cst_7 : f32 to vector<16x1xf32>
    %7 = arith.divf %5, %6 : vector<16x1xf32>
    %8 = vector.broadcast %7 : vector<16x1xf32> to vector<16x32xf32>
    %9 = arith.subf %0, %8 : vector<16x32xf32>
    %10 = arith.mulf %9, %9 : vector<16x32xf32>
    %cst_8 = arith.constant dense<0.000000e+00> : vector<16xf32>
    %11 = vector.multi_reduction <add>, %10, %cst_8 [1] : vector<16x32xf32> to vector<16xf32>
    %12 = vector.shape_cast %11 : vector<16xf32> to vector<16x1xf32>
    %cst_9 = arith.constant 3.200000e+01 : f32
    %13 = vector.broadcast %cst_9 : f32 to vector<16x1xf32>
    %14 = arith.divf %12, %13 : vector<16x1xf32>
    %15 = vector.broadcast %7 : vector<16x1xf32> to vector<16x32xf32>
    %16 = arith.subf %0, %15 : vector<16x32xf32>
    %cst_10 = arith.constant 9.99999974E-6 : f32
    %17 = vector.broadcast %cst_10 : f32 to vector<16x1xf32>
    %18 = arith.addf %14, %17 : vector<16x1xf32>
    %19 = math.rsqrt %18 : vector<16x1xf32>
    %20 = vector.broadcast %19 : vector<16x1xf32> to vector<16x32xf32>
    %21 = arith.mulf %16, %20 : vector<16x32xf32>
    %22 = vector.broadcast %2 : vector<1x32xf32> to vector<16x32xf32>
    %23 = arith.mulf %21, %22 : vector<16x32xf32>
    %24 = vector.broadcast %3 : vector<1x32xf32> to vector<16x32xf32>
    %25 = arith.addf %23, %24 : vector<16x32xf32>
    %c0_11 = arith.constant 0 : index
    %c0_12 = arith.constant 0 : index
    %26 = vector.load %arg5[%c0_11, %c0_12] : memref<32x192xf32, #tpu.memory_space<vmem>>, vector<32x192xf32>
    %cst_13 = arith.constant dense<0.000000e+00> : vector<16x192xf32>
    %27 = tpu.matmul %25, %26, %cst_13 {dimension_numbers = #tpu.dot_dimension_numbers<[1], [0], [0], [1], [0, 0, 1, 1], [], []>} : vector<16x32xf32>, vector<32x192xf32>, vector<16x192xf32> -> vector<16x192xf32>
    %c0_14 = arith.constant 0 : index
    %c0_15 = arith.constant 0 : index
    %28 = vector.load %arg6[%c0_14, %c0_15] : memref<1x192xf32, #tpu.memory_space<vmem>>, vector<1x192xf32>
    %29 = vector.broadcast %28 : vector<1x192xf32> to vector<16x192xf32>
    %30 = arith.addf %27, %29 : vector<16x192xf32>
    %31 = vector.extract_strided_slice %30 {offsets = [0, 0], sizes = [16, 32], strides = [1, 1]} : vector<16x192xf32> to vector<16x32xf32>
    %32 = vector.extract_strided_slice %30 {offsets = [0, 32], sizes = [16, 32], strides = [1, 1]} : vector<16x192xf32> to vector<16x32xf32>
    %33 = vector.extract_strided_slice %30 {offsets = [0, 64], sizes = [16, 32], strides = [1, 1]} : vector<16x192xf32> to vector<16x32xf32>
    %cst_16 = arith.constant dense<0.000000e+00> : vector<16x16xf32>
    %34 = tpu.matmul %31, %32, %cst_16 {dimension_numbers = #tpu.dot_dimension_numbers<[1], [1], [0], [0], [0, 0, 1, 0], [], []>} : vector<16x32xf32>, vector<16x32xf32>, vector<16x16xf32> -> vector<16x16xf32>
    %35 = arith.addf %34, %1 : vector<16x16xf32>
    %cst_17 = arith.constant dense<0xFF800000> : vector<16xf32>
    %36 = vector.multi_reduction <maximumf>, %35, %cst_17 [1] : vector<16x16xf32> to vector<16xf32>
    %37 = vector.shape_cast %36 : vector<16xf32> to vector<16x1xf32>
    %38 = vector.broadcast %37 : vector<16x1xf32> to vector<16x16xf32>
    %39 = arith.subf %35, %38 : vector<16x16xf32>
    %40 = math.exp %39 : vector<16x16xf32>
    %cst_18 = arith.constant dense<0.000000e+00> : vector<16xf32>
    %41 = vector.multi_reduction <add>, %40, %cst_18 [1] : vector<16x16xf32> to vector<16xf32>
    %42 = vector.shape_cast %41 : vector<16xf32> to vector<16x1xf32>
    %43 = tpu.reciprocal %42 {approx = true} : vector<16x1xf32> -> vector<16x1xf32>
    %44 = vector.broadcast %43 : vector<16x1xf32> to vector<16x16xf32>
    %45 = arith.mulf %40, %44 : vector<16x16xf32>
    %cst_19 = arith.constant dense<0.000000e+00> : vector<16x32xf32>
    %46 = tpu.matmul %45, %33, %cst_19 {dimension_numbers = #tpu.dot_dimension_numbers<[1], [0], [0], [1], [0, 0, 1, 1], [], []>} : vector<16x16xf32>, vector<16x32xf32>, vector<16x32xf32> -> vector<16x32xf32>
    %c0_20 = arith.constant 0 : index
    %c0_21 = arith.constant 0 : index
    %c0_22 = arith.constant 0 : index
    %47 = vector.load %arg7[%c0_20, %c0_21, %c0_22] : memref<2x32x32xf32, #tpu.memory_space<vmem>>, vector<1x32x32xf32>
    %48 = vector.shape_cast %47 : vector<1x32x32xf32> to vector<32x32xf32>
    %cst_23 = arith.constant dense<0.000000e+00> : vector<16x32xf32>
    %49 = tpu.matmul %46, %48, %cst_23 {dimension_numbers = #tpu.dot_dimension_numbers<[1], [0], [0], [1], [0, 0, 1, 1], [], []>} : vector<16x32xf32>, vector<32x32xf32>, vector<16x32xf32> -> vector<16x32xf32>
    %50 = vector.extract_strided_slice %30 {offsets = [0, 96], sizes = [16, 32], strides = [1, 1]} : vector<16x192xf32> to vector<16x32xf32>
    %51 = vector.extract_strided_slice %30 {offsets = [0, 128], sizes = [16, 32], strides = [1, 1]} : vector<16x192xf32> to vector<16x32xf32>
    %52 = vector.extract_strided_slice %30 {offsets = [0, 160], sizes = [16, 32], strides = [1, 1]} : vector<16x192xf32> to vector<16x32xf32>
    %cst_24 = arith.constant dense<0.000000e+00> : vector<16x16xf32>
    %53 = tpu.matmul %50, %51, %cst_24 {dimension_numbers = #tpu.dot_dimension_numbers<[1], [1], [0], [0], [0, 0, 1, 0], [], []>} : vector<16x32xf32>, vector<16x32xf32>, vector<16x16xf32> -> vector<16x16xf32>
    %54 = arith.addf %53, %1 : vector<16x16xf32>
    %cst_25 = arith.constant dense<0xFF800000> : vector<16xf32>
    %55 = vector.multi_reduction <maximumf>, %54, %cst_25 [1] : vector<16x16xf32> to vector<16xf32>
    %56 = vector.shape_cast %55 : vector<16xf32> to vector<16x1xf32>
    %57 = vector.broadcast %56 : vector<16x1xf32> to vector<16x16xf32>
    %58 = arith.subf %54, %57 : vector<16x16xf32>
    %59 = math.exp %58 : vector<16x16xf32>
    %cst_26 = arith.constant dense<0.000000e+00> : vector<16xf32>
    %60 = vector.multi_reduction <add>, %59, %cst_26 [1] : vector<16x16xf32> to vector<16xf32>
    %61 = vector.shape_cast %60 : vector<16xf32> to vector<16x1xf32>
    %62 = tpu.reciprocal %61 {approx = true} : vector<16x1xf32> -> vector<16x1xf32>
    %63 = vector.broadcast %62 : vector<16x1xf32> to vector<16x16xf32>
    %64 = arith.mulf %59, %63 : vector<16x16xf32>
    %cst_27 = arith.constant dense<0.000000e+00> : vector<16x32xf32>
    %65 = tpu.matmul %64, %52, %cst_27 {dimension_numbers = #tpu.dot_dimension_numbers<[1], [0], [0], [1], [0, 0, 1, 1], [], []>} : vector<16x16xf32>, vector<16x32xf32>, vector<16x32xf32> -> vector<16x32xf32>
    %c1 = arith.constant 1 : index
    %c0_28 = arith.constant 0 : index
    %c0_29 = arith.constant 0 : index
    %66 = vector.load %arg7[%c1, %c0_28, %c0_29] : memref<2x32x32xf32, #tpu.memory_space<vmem>>, vector<1x32x32xf32>
    %67 = vector.shape_cast %66 : vector<1x32x32xf32> to vector<32x32xf32>
    %cst_30 = arith.constant dense<0.000000e+00> : vector<16x32xf32>
    %68 = tpu.matmul %65, %67, %cst_30 {dimension_numbers = #tpu.dot_dimension_numbers<[1], [0], [0], [1], [0, 0, 1, 1], [], []>} : vector<16x32xf32>, vector<32x32xf32>, vector<16x32xf32> -> vector<16x32xf32>
    %69 = arith.addf %49, %68 : vector<16x32xf32>
    %c0_31 = arith.constant 0 : index
    %c0_32 = arith.constant 0 : index
    %70 = vector.load %arg8[%c0_31, %c0_32] : memref<1x32xf32, #tpu.memory_space<vmem>>, vector<1x32xf32>
    %71 = vector.broadcast %70 : vector<1x32xf32> to vector<16x32xf32>
    %72 = arith.addf %69, %71 : vector<16x32xf32>
    %73 = arith.addf %72, %25 : vector<16x32xf32>
    %c0_33 = arith.constant 0 : index
    %c0_34 = arith.constant 0 : index
    %74 = vector.load %arg9[%c0_33, %c0_34] : memref<1x32xf32, #tpu.memory_space<vmem>>, vector<1x32xf32>
    %c0_35 = arith.constant 0 : index
    %c0_36 = arith.constant 0 : index
    %75 = vector.load %arg10[%c0_35, %c0_36] : memref<1x32xf32, #tpu.memory_space<vmem>>, vector<1x32xf32>
    %cst_37 = arith.constant dense<0.000000e+00> : vector<16xf32>
    %76 = vector.multi_reduction <add>, %73, %cst_37 [1] : vector<16x32xf32> to vector<16xf32>
    %77 = vector.shape_cast %76 : vector<16xf32> to vector<16x1xf32>
    %cst_38 = arith.constant 3.200000e+01 : f32
    %78 = vector.broadcast %cst_38 : f32 to vector<16x1xf32>
    %79 = arith.divf %77, %78 : vector<16x1xf32>
    %80 = vector.broadcast %79 : vector<16x1xf32> to vector<16x32xf32>
    %81 = arith.subf %73, %80 : vector<16x32xf32>
    %82 = arith.mulf %81, %81 : vector<16x32xf32>
    %cst_39 = arith.constant dense<0.000000e+00> : vector<16xf32>
    %83 = vector.multi_reduction <add>, %82, %cst_39 [1] : vector<16x32xf32> to vector<16xf32>
    %84 = vector.shape_cast %83 : vector<16xf32> to vector<16x1xf32>
    %cst_40 = arith.constant 3.200000e+01 : f32
    %85 = vector.broadcast %cst_40 : f32 to vector<16x1xf32>
    %86 = arith.divf %84, %85 : vector<16x1xf32>
    %87 = vector.broadcast %79 : vector<16x1xf32> to vector<16x32xf32>
    %88 = arith.subf %73, %87 : vector<16x32xf32>
    %cst_41 = arith.constant 9.99999974E-6 : f32
    %89 = vector.broadcast %cst_41 : f32 to vector<16x1xf32>
    %90 = arith.addf %86, %89 : vector<16x1xf32>
    %91 = math.rsqrt %90 : vector<16x1xf32>
    %92 = vector.broadcast %91 : vector<16x1xf32> to vector<16x32xf32>
    %93 = arith.mulf %88, %92 : vector<16x32xf32>
    %94 = vector.broadcast %74 : vector<1x32xf32> to vector<16x32xf32>
    %95 = arith.mulf %93, %94 : vector<16x32xf32>
    %96 = vector.broadcast %75 : vector<1x32xf32> to vector<16x32xf32>
    %97 = arith.addf %95, %96 : vector<16x32xf32>
    %c0_42 = arith.constant 0 : index
    %c0_43 = arith.constant 0 : index
    %98 = vector.load %arg11[%c0_42, %c0_43] : memref<32x128xf32, #tpu.memory_space<vmem>>, vector<32x128xf32>
    %cst_44 = arith.constant dense<0.000000e+00> : vector<16x128xf32>
    %99 = tpu.matmul %97, %98, %cst_44 {dimension_numbers = #tpu.dot_dimension_numbers<[1], [0], [0], [1], [0, 0, 1, 1], [], []>} : vector<16x32xf32>, vector<32x128xf32>, vector<16x128xf32> -> vector<16x128xf32>
    %c0_45 = arith.constant 0 : index
    %c0_46 = arith.constant 0 : index
    %100 = vector.load %arg12[%c0_45, %c0_46] : memref<1x128xf32, #tpu.memory_space<vmem>>, vector<1x128xf32>
    %101 = vector.broadcast %100 : vector<1x128xf32> to vector<16x128xf32>
    %102 = arith.addf %99, %101 : vector<16x128xf32>
    %cst_47 = arith.constant 5.000000e-01 : f32
    %103 = vector.broadcast %cst_47 : f32 to vector<16x128xf32>
    %104 = arith.mulf %103, %102 : vector<16x128xf32>
    %cst_48 = arith.constant 0.707106769 : f32
    %105 = vector.broadcast %cst_48 : f32 to vector<16x128xf32>
    %106 = arith.mulf %102, %105 : vector<16x128xf32>
    %cst_49 = arith.constant 0.000000e+00 : f32
    %107 = vector.broadcast %cst_49 : f32 to vector<16x128xf32>
    %108 = arith.cmpf oge, %106, %107 : vector<16x128xf32>
    %cst_50 = arith.constant 1.000000e+00 : f32
    %cst_51 = arith.constant -1.000000e+00 : f32
    %109 = vector.broadcast %cst_50 : f32 to vector<16x128xf32>
    %110 = vector.broadcast %cst_51 : f32 to vector<16x128xf32>
    %111 = arith.select %108, %109, %110 : vector<16x128xi1>, vector<16x128xf32>
    %112 = math.absf %106 : vector<16x128xf32>
    %cst_52 = arith.constant 0.327591091 : f32
    %113 = vector.broadcast %cst_52 : f32 to vector<16x128xf32>
    %114 = arith.mulf %113, %112 : vector<16x128xf32>
    %cst_53 = arith.constant 1.000000e+00 : f32
    %115 = vector.broadcast %cst_53 : f32 to vector<16x128xf32>
    %116 = arith.addf %115, %114 : vector<16x128xf32>
    %117 = tpu.reciprocal %116 {approx = true} : vector<16x128xf32> -> vector<16x128xf32>
    %cst_54 = arith.constant 1.06140542 : f32
    %118 = vector.broadcast %cst_54 : f32 to vector<16x128xf32>
    %119 = arith.mulf %118, %117 : vector<16x128xf32>
    %cst_55 = arith.constant -1.45315206 : f32
    %120 = vector.broadcast %cst_55 : f32 to vector<16x128xf32>
    %121 = arith.addf %119, %120 : vector<16x128xf32>
    %122 = arith.mulf %121, %117 : vector<16x128xf32>
    %cst_56 = arith.constant 1.42141378 : f32
    %123 = vector.broadcast %cst_56 : f32 to vector<16x128xf32>
    %124 = arith.addf %122, %123 : vector<16x128xf32>
    %125 = arith.mulf %124, %117 : vector<16x128xf32>
    %cst_57 = arith.constant -0.284496725 : f32
    %126 = vector.broadcast %cst_57 : f32 to vector<16x128xf32>
    %127 = arith.addf %125, %126 : vector<16x128xf32>
    %128 = arith.mulf %127, %117 : vector<16x128xf32>
    %cst_58 = arith.constant 0.254829586 : f32
    %129 = vector.broadcast %cst_58 : f32 to vector<16x128xf32>
    %130 = arith.addf %128, %129 : vector<16x128xf32>
    %131 = arith.mulf %130, %117 : vector<16x128xf32>
    %cst_59 = arith.constant 0.000000e+00 : f32
    %132 = vector.broadcast %cst_59 : f32 to vector<16x128xf32>
    %133 = arith.subf %132, %112 : vector<16x128xf32>
    %134 = arith.mulf %133, %112 : vector<16x128xf32>
    %135 = math.exp %134 : vector<16x128xf32>
    %136 = arith.mulf %131, %135 : vector<16x128xf32>
    %cst_60 = arith.constant 1.000000e+00 : f32
    %137 = vector.broadcast %cst_60 : f32 to vector<16x128xf32>
    %138 = arith.subf %137, %136 : vector<16x128xf32>
    %139 = arith.mulf %111, %138 : vector<16x128xf32>
    %cst_61 = arith.constant 1.000000e+00 : f32
    %140 = vector.broadcast %cst_61 : f32 to vector<16x128xf32>
    %141 = arith.addf %140, %139 : vector<16x128xf32>
    %142 = arith.mulf %104, %141 : vector<16x128xf32>
    %c0_62 = arith.constant 0 : index
    %c0_63 = arith.constant 0 : index
    %143 = vector.load %arg13[%c0_62, %c0_63] : memref<128x32xf32, #tpu.memory_space<vmem>>, vector<128x32xf32>
    %cst_64 = arith.constant dense<0.000000e+00> : vector<16x32xf32>
    %144 = tpu.matmul %142, %143, %cst_64 {dimension_numbers = #tpu.dot_dimension_numbers<[1], [0], [0], [1], [0, 0, 1, 1], [], []>} : vector<16x128xf32>, vector<128x32xf32>, vector<16x32xf32> -> vector<16x32xf32>
    %c0_65 = arith.constant 0 : index
    %c0_66 = arith.constant 0 : index
    %145 = vector.load %arg14[%c0_65, %c0_66] : memref<1x32xf32, #tpu.memory_space<vmem>>, vector<1x32xf32>
    %146 = vector.broadcast %145 : vector<1x32xf32> to vector<16x32xf32>
    %147 = arith.addf %144, %146 : vector<16x32xf32>
    %148 = arith.addf %147, %97 : vector<16x32xf32>
    %c0_67 = arith.constant 0 : index
    %c0_68 = arith.constant 0 : index
    %149 = vector.load %arg15[%c0_67, %c0_68] : memref<16x32xf32, #tpu.memory_space<vmem>>, vector<16x32xf32>
    tpu.vector_store %arg15[%c0_67, %c0_68], %148 {strides = array<i32>} : memref<16x32xf32, #tpu.memory_space<vmem>>, vector<16x32xf32>,
    return
  }
  func.func @transform_0(%arg0: i32) -> (i32, i32) {
    %c0_i32 = arith.constant 0 : i32
    %c0_i32_0 = arith.constant 0 : i32
    return %arg0, %c0_i32 : i32, i32
  }
  func.func @transform_1(%arg0: i32) -> (i32, i32) {
    %c0_i32 = arith.constant 0 : i32
    %c0_i32_0 = arith.constant 0 : i32
    %c0_i32_1 = arith.constant 0 : i32
    return %c0_i32, %c0_i32_0 : i32, i32
  }
  func.func @transform_2(%arg0: i32) -> (i32, i32) {
    %c0_i32 = arith.constant 0 : i32
    %c0_i32_0 = arith.constant 0 : i32
    %c0_i32_1 = arith.constant 0 : i32
    return %c0_i32, %c0_i32_0 : i32, i32
  }
  func.func @transform_3(%arg0: i32) -> (i32, i32) {
    %c0_i32 = arith.constant 0 : i32
    %c0_i32_0 = arith.constant 0 : i32
    %c0_i32_1 = arith.constant 0 : i32
    return %c0_i32, %c0_i32_0 : i32, i32
  }
  func.func @transform_4(%arg0: i32) -> (i32, i32) {
    %c0_i32 = arith.constant 0 : i32
    %c0_i32_0 = arith.constant 0 : i32
    %c0_i32_1 = arith.constant 0 : i32
    return %c0_i32, %c0_i32_0 : i32, i32
  }
  func.func @transform_5(%arg0: i32) -> (i32, i32) {
    %c0_i32 = arith.constant 0 : i32
    %c0_i32_0 = arith.constant 0 : i32
    %c0_i32_1 = arith.constant 0 : i32
    return %c0_i32, %c0_i32_0 : i32, i32
  }
  func.func @transform_6(%arg0: i32) -> (i32, i32, i32) {
    %c0_i32 = arith.constant 0 : i32
    %c0_i32_0 = arith.constant 0 : i32
    %c0_i32_1 = arith.constant 0 : i32
    %c0_i32_2 = arith.constant 0 : i32
    return %c0_i32, %c0_i32_0, %c0_i32_1 : i32, i32, i32
  }
  func.func @transform_7(%arg0: i32) -> (i32, i32) {
    %c0_i32 = arith.constant 0 : i32
    %c0_i32_0 = arith.constant 0 : i32
    %c0_i32_1 = arith.constant 0 : i32
    return %c0_i32, %c0_i32_0 : i32, i32
  }
  func.func @transform_8(%arg0: i32) -> (i32, i32) {
    %c0_i32 = arith.constant 0 : i32
    %c0_i32_0 = arith.constant 0 : i32
    %c0_i32_1 = arith.constant 0 : i32
    return %c0_i32, %c0_i32_0 : i32, i32
  }
  func.func @transform_9(%arg0: i32) -> (i32, i32) {
    %c0_i32 = arith.constant 0 : i32
    %c0_i32_0 = arith.constant 0 : i32
    %c0_i32_1 = arith.constant 0 : i32
    return %c0_i32, %c0_i32_0 : i32, i32
  }
  func.func @transform_10(%arg0: i32) -> (i32, i32) {
    %c0_i32 = arith.constant 0 : i32
    %c0_i32_0 = arith.constant 0 : i32
    %c0_i32_1 = arith.constant 0 : i32
    return %c0_i32, %c0_i32_0 : i32, i32
  }
  func.func @transform_11(%arg0: i32) -> (i32, i32) {
    %c0_i32 = arith.constant 0 : i32
    %c0_i32_0 = arith.constant 0 : i32
    %c0_i32_1 = arith.constant 0 : i32
    return %c0_i32, %c0_i32_0 : i32, i32
  }
  func.func @transform_12(%arg0: i32) -> (i32, i32) {
    %c0_i32 = arith.constant 0 : i32
    %c0_i32_0 = arith.constant 0 : i32
    %c0_i32_1 = arith.constant 0 : i32
    return %c0_i32, %c0_i32_0 : i32, i32
  }
  func.func @transform_13(%arg0: i32) -> (i32, i32) {
    %c0_i32 = arith.constant 0 : i32
    %c0_i32_0 = arith.constant 0 : i32
    %c0_i32_1 = arith.constant 0 : i32
    return %c0_i32, %c0_i32_0 : i32, i32
  }
  func.func @transform_14(%arg0: i32) -> (i32, i32) {
    %c0_i32 = arith.constant 0 : i32
    %c0_i32_0 = arith.constant 0 : i32
    return %arg0, %c0_i32 : i32, i32
  }
}

</mosaic_0001>

<bundles_post_ra>
// kernel: tpu_custom_call.1
= control target key start
LH: loop header
LB: loop body
LE: loop exit
PB: predicated region body
PF: predicated region fallthrough
CT: control target
= control target key end

     0   :  { %19 = vsyncpa [#allocation3], 0  ;;  %s1852_s0 = inlined_call_operand.hbm [shape: f32[16,32], index: 0, kind: input, shape index: {}]   ;;  %s1853_s1 = inlined_call_operand.hbm [shape: f32[16,16], index: 1, kind: input, shape index: {}]   ;;  %s1854_s2 = inlined_call_operand.vmem [shape: f32[1,32], index: 2, kind: input, shape index: {}]   ;;  %s1855_s3 = inlined_call_operand.vmem [shape: f32[1,32], index: 3, kind: input, shape index: {}]   ;;  %s1856_s4 = inlined_call_operand.vmem [shape: f32[32,192], index: 4, kind: input, shape index: {}]   ;;  %s1857_s5 = inlined_call_operand.vmem [shape: f32[1,192], index: 5, kind: input, shape index: {}]   ;;  %s1858_s6 = inlined_call_operand.vmem [shape: f32[2,32,32], index: 6, kind: input, shape index: {}]   ;;  %s1859_s7 = inlined_call_operand.vmem [shape: f32[1,32], index: 7, kind: input, shape index: {}]   ;;  %s1860_s8 = inlined_call_operand.vmem [shape: f32[1,32], index: 8, kind: input, shape index: {}]   ;;  %s1861_s9 = inlined_call_operand.vmem [shape: f32[1,32], index: 9, kind: input, shape index: {}]   ;;  %s1862_s10 = inlined_call_operand.vmem [shape: f32[32,128], index: 10, kind: input, shape index: {}]   ;;  %s1863_s11 = inlined_call_operand.vmem [shape: f32[1,128], index: 11, kind: input, shape index: {}]   ;;  %s1864_s12 = inlined_call_operand.vmem [shape: f32[128,32], index: 12, kind: input, shape index: {}]   ;;  %s1865_s13 = inlined_call_operand.vmem [shape: f32[1,32], index: 13, kind: input, shape index: {}]   ;;  %s1866_s14 = inlined_call_operand.hbm [shape: f32[16,32], index: 14, kind: output, shape index: {}]  }
   0x1   :  { %20 = vsyncpa [#allocation6], 0 }
   0x2   :  { %21 = vsyncpa [#allocation4], 0  ;;  %s1510_s29 = smov [#allocation2]   ;;  %s1438_s17 = scalar_lea.hbm %s1852_s0, 256 }
   0x3   :  { %s27_s30 = sshll.u32 %s1510_s29, 4  ;;  %p1439_p0 = scmp.ne.s32.totalorder %s1852_s0, %s1438_s17  ;;  %s28_s30 = int_to_ptr.vmem [resolvable:$true] %s27_s30 }
   0x4   :  { %p1442_p1 = scmp.lt.u32.totalorder %s1438_s17, %s1852_s0 }
   0x6   :  { %p1444_p2 = pnand %p1442_p1, %p1439_p0 }
   0x8   :  { %1447 = shalt.err (!%p1444_p2)
}
   0x9   :  { %s1448_s22 = scalar_lea.vmem %s28_s30, 256  ;;  %p1453_p4 = scmp.lt.s32.totalorder %s28_s30, %s28_s30 }
   0xa   :  { %p1449_p3 = scmp.ne.s32.totalorder %s28_s30, %s1448_s22  ;;  %p1454_p5 = scmp.lt.s32.totalorder %s1448_s22, %s1448_s22 }
   0xc   :  { %p1455_p6 = por %p1454_p5, %p1453_p4 }
   0xe   :  { %p1456_p7 = pnand %p1455_p6, %p1449_p3 }
  0x10   :  { %1459 = shalt.err (!%p1456_p7)
}
  0x11   :  { %s1511_s23 = smov 128   ;;  %s1512_s24 = smov 8  }
  0x12   :  { %33 = dma.hbm_to_vmem [thread:$0]  %s1852_s0, 256, %s28_s30, [#allocation3], %s1511_s23, %s1511_s23, %s1512_s24  }
  0x13   :  { %s1513_s27 = smov [#allocation5]   ;;  %s1460_s16 = scalar_lea.hbm %s1853_s1, 256 }
  0x14   :  { %s39_s28 = sshll.u32 %s1513_s27, 4  ;;  %p1461_p8 = scmp.ne.s32.totalorder %s1853_s1, %s1460_s16  ;;  %s40_s28 = int_to_ptr.vmem [resolvable:$true] %s39_s28 }
  0x15   :  { %p1464_p9 = scmp.lt.u32.totalorder %s1460_s16, %s1853_s1 }
  0x17   :  { %p1466_p10 = pnand %p1464_p9, %p1461_p8 }
  0x19   :  { %1469 = shalt.err (!%p1466_p10)
}
  0x1a   :  { %s1470_s21 = scalar_lea.vmem %s40_s28, 256  ;;  %p1475_p12 = scmp.lt.s32.totalorder %s40_s28, %s40_s28 }
  0x1b   :  { %p1471_p11 = scmp.ne.s32.totalorder %s40_s28, %s1470_s21  ;;  %p1476_p13 = scmp.lt.s32.totalorder %s1470_s21, %s1470_s21 }
  0x1d   :  { %p1477_p0 = por %p1476_p13, %p1475_p12 }
  0x1f   :  { %p1478_p1 = pnand %p1477_p0, %p1471_p11 }
  0x21   :  { %1481 = shalt.err (!%p1478_p1)
}
  0x22   :  { %45 = dma.hbm_to_vmem [thread:$0]  %s1853_s1, 256, %s40_s28, [#allocation6], %s1511_s23, %s1511_s23, %s1512_s24  }
  0x23   :  { %1504 = dma.done.wait [#allocation3], 256  }
  0x24   :  { %1505 = vsyncadd [#allocation3], 4294967040 }
  0x25   :  { %1506 = dma.done.wait [#allocation6], 256  }
  0x26   :  { %1507 = vsyncadd [#allocation6], 4294967040  ;;  %vm82_vm0 = vcmask 261120   ;;  %v76_v0 = vld [vmem:[#allocation2] sm:$0xff]  ;;  %v77_v1 = vld [vmem:[#allocation2 + $0x8] sm:$0xff]  ;;  %v1514_v21 = vmov 0.0   ;;  %v136_v43 = vlaneseq }
  0x27   :  { %v83_v2 = vsel %vm82_vm0, %v76_v0, 0.0  ;;  %v86_v3 = vsel %vm82_vm0, %v77_v1, 0.0  ;;  %v127_v14 = vld [vmem:[%s1856_s4 + $0x8] sm:$0xff]  ;;  %v129_v15 = vld [vmem:[%s1856_s4 + $0x18] sm:$0xff]  ;;  %v126_v16 = vld [vmem:[%s1856_s4] sm:$0xff]  ;;  %216 = vmatprep.mubr.f32.mxu0 %v1514_v21  ;;  %s1516_s26 = smov 32  }
  0x28   :  { %84 = vadd.xlane.f32.xlu0 %v83_v2  ;;  %v1295_v17 = vpack.c.bf16 %v129_v15, %v127_v14  ;;  %v128_v18 = vld [vmem:[%s1856_s4 + $0x10] sm:$0xff]  ;;  %v131_v19 = vld [vmem:[%s1856_s4 + $0x28] sm:$0xff]  ;;  %v133_v20 = vld [vmem:[%s1856_s4 + $0x38] sm:$0xff]  ;;  %v137_v44 = vshrl.u32 %v136_v43, 7  ;;  %vm318_vm2 = vcmask 130048   ;;  %s1517_s27 = smov 64  }
  0x29   :  { %v1297_v22 = vpack.c.bf16 %v128_v18, %v126_v16  ;;  %v1299_v23 = vpack.c.bf16 %v133_v20, %v131_v19  ;;  %v130_v24 = vld [vmem:[%s1856_s4 + $0x20] sm:$0xff]  ;;  %v132_v25 = vld [vmem:[%s1856_s4 + $0x30] sm:$0xff]  ;;  %vm1682_vm1 = vmpackc.low %vm82_vm0, %vm82_vm0  ;;  %s1519_s25 = smov [#allocation7]  }
  0x2a   :  { %1296 = vmatprep.subr.bf16.mxu0 %v1295_v17  ;;  %v1301_v26 = vpack.c.bf16 %v132_v25, %v130_v24  ;;  %v1116_v34 = vld [vmem:[%s1854_s2] ss:$0 sm:$0xff]  ;;  %v138_v45 = vsub.s32 0, %v137_v44  ;;  %v142_v48 = vsub.s32 1, %v137_v44  ;;  %v78_v2 = vld [vmem:[#allocation5] sm:$0xff]  ;;  %s1103_s2 = sshll.u32 %s1519_s25, 4  ;;  %s1104_s2 = int_to_ptr.vmem [resolvable:$true] %s1103_s2 }
  0x2b   :  { %1298 = vmatpush1.bf16.msra.mxu0 %v1297_v22  ;;  %v1117_v36 = vld [vmem:[%s1855_s3] ss:$0 sm:$0xff]  ;;  %s1482_s3 = scalar_lea.vmem %s1104_s2, 256  ;;  %p1487_p3 = scmp.lt.s32.totalorder %s1104_s2, %s1104_s2 }
  0x2c   :  { %87 = vadd.xlane.f32.xlu0 %v86_v3  ;;  %1300 = vmatprep.subr.bf16.mxu0 %v1299_v23  ;;  %v134_v46 = vld [vmem:[%s1857_s5] sm:$0x3]  ;;  %s1515_s5 = smov 96   ;;  %p1483_p2 = scmp.ne.s32.totalorder %s1104_s2, %s1482_s3 }
  0x2d   :  { %v139_v47 = vrot.slane %v134_v46, %v138_v45  ;;  %v143_v52 = vrot.slane %v134_v46, %v142_v48  ;;  %p1488_p4 = scmp.lt.s32.totalorder %s1482_s3, %s1482_s3 }
  0x2f   :  { %1302 = vmatpush1.bf16.msra.mxu0 %v1301_v26  ;;  %p1489_p5 = por %p1488_p4, %p1487_p3 }
  0x31   :  { %p1490_p6 = pnand %p1489_p5, %p1483_p2 }
  0xb5   :  { %v85_v4 = vpop.xlane.xlu0 %84 }
  0xb6   :  { %v90_v5 = vmul.f32 0.03125, %v85_v4  ;;  %v79_v4 = vld [vmem:[#allocation5 + $0x8] sm:$0xff] }
  0xb8   :  { %v92_v6 = vsub.f32 %v76_v0, %v90_v5 }
  0xb9   :  { %v88_v7 = vpop.xlane.xlu0 %87 }
  0xba   :  { %v91_v8 = vmul.f32 0.03125, %v88_v7  ;;  %v94_v9 = vmul.f32 %v92_v6, %v92_v6 }
  0xbc   :  { %v93_v10 = vsub.f32 %v77_v1, %v91_v8  ;;  %v96_v11 = vsel %vm82_vm0, %v94_v9, 0.0 }
  0xbd   :  { %97 = vadd.xlane.f32.xlu1 %v96_v11 }
  0xbe   :  { %v95_v12 = vmul.f32 %v93_v10, %v93_v10 }
  0xc0   :  { %v99_v13 = vsel %vm82_vm0, %v95_v12, 0.0 }
  0xc1   :  { %100 = vadd.xlane.f32.xlu1 %v99_v13 }
 0x14a   :  { %v98_v27 = vpop.xlane.xlu1 %97 }
 0x14b   :  { %v102_v28 = vmul.f32 0.03125, %v98_v27 }
 0x14d   :  { %v104_v29 = vadd.f32 1e-05, %v102_v28 }
 0x14e   :  { %v101_v30 = vpop.xlane.xlu1 %100 }
 0x14f   :  { %1406 = vrsqrt.f32 %v104_v29  ;;  %v103_v31 = vmul.f32 0.03125, %v101_v30 }
 0x151   :  { %v105_v32 = vadd.f32 1e-05, %v103_v31 }
 0x153   :  { %1408 = vrsqrt.f32 %v105_v32 }
 0x159   :  { %v1407_v33 = vpop.eup %1406 }
 0x15a   :  { %v108_v35 = vmul.f32 %v1407_v33, %v92_v6 }
 0x15c   :  { %v116_v37 = vmul.f32 %v1116_v34, %v108_v35 }
 0x15d   :  { %v1409_v38 = vpop.eup %1408 }
 0x15e   :  { %v1659_v39 = vadd.f32 %v1117_v36, %v116_v37  ;;  %v109_v40 = vmul.f32 %v1409_v38, %v93_v10 }
 0x160   :  { %1118 = vmatmul.mubr.msk.f32.vlgmr.msra.gmra.mrb[0].mxu0 %vm82_vm0, %v1659_v39  ;;  %v117_v41 = vmul.f32 %v1116_v34, %v109_v40 }
 0x161   :  { %222 = vmatprep.mubr.f32.mxu0 %v1514_v21 }
 0x162   :  { %v1663_v42 = vadd.f32 %v1117_v36, %v117_v41 }
 0x164   :  { %1119 = vmatmul.mubr.msk.f32.gmra.mrb[2].mxu0 %vm82_vm0, %v1663_v42 }
 0x233   :  { %v218_v49 = vpop.f32.mrb[0].mxu0 }
 0x234   :  { %v219_v50 = vadd.f32 %v218_v49, %v139_v47  ;;  %v220_v51 = vpop.f32.mrb[1].mxu0 }
 0x235   :  { %v1671_v56 = vadd.f32 %v220_v51, %v143_v52 }
 0x236   :  { %1203 = vmatprep.mubr.msk.f32.mxu0 %vm82_vm0, %v219_v50 }
 0x237   :  { %v224_v53 = vpop.f32.mrb[2].mxu0 }
 0x238   :  { %v225_v54 = vadd.f32 %v224_v53, %v139_v47  ;;  %v226_v55 = vpop.f32.mrb[3].mxu0  ;;  %v1133_v53 = vld [vmem:[%s1858_s6 + $0x28] sm:$0xff] }
 0x239   :  { %v1673_v57 = vadd.f32 %v226_v55, %v143_v52  ;;  %v1132_v52 = vld [vmem:[%s1858_s6 + $0x20] sm:$0xff] }
 0x23a   :  { %v1391_v58 = vpack.i.bf16 %v225_v54, %v219_v50  ;;  %v1323_v55 = vpack.c.bf16 %v1133_v53, %v1132_v52  ;;  %v996_v53 = vld [vmem:[%s1864_s12] sm:$0xff] }
 0x23b   :  { %v1401_v59 = vpack.i.bf16 %v1673_v57, %v1671_v56  ;;  %v1313_v60 = vpack.c.bf16 %v1673_v57, %v1671_v56 }
 0x23c   :  { %1392 = vrot.lane.b32.xlu0 %v1391_v58, %s1515_s5 }
 0x240   :  { %432 = vrot.lane.b32.xlu0 %v219_v50, %s1516_s26 }
 0x244   :  { %434 = vrot.lane.b32.xlu0 %v225_v54, %s1516_s26 }
 0x2ae   :  { %v1393_v61 = vpop.permute.xlu0 %1392 }
 0x2af   :  { %v1395_v62 = vunpack.i.h.bf16 %v1393_v61  ;;  %v1394_v63 = vunpack.i.l.bf16 %v1393_v61 }
 0x2b1   :  { %v1303_v1 = vpack.c.bf16 %v1395_v62, %v1394_v63 }
 0x2b2   :  { %v433_v30 = vpop.permute.xlu0 %432 }
 0x2b3   :  { %1305 = vmatprep.subr.msk.bf16.mxu0 %vm1682_vm1, %v1303_v1 }
 0x2b4   :  { %1308 = vmatpush3.bf16.xpose.msk.msra.mxu0 %vm1682_vm1, %v1303_v1 }
 0x2b6   :  { %v435_v31 = vpop.permute.xlu0 %434 }
 0x2bb   :  { %1204 = vmatmul.mubr.msk.f32.vlgmr.msra.gmra.mrb[4].mxu0 %vm82_vm0, %v225_v54  ;;  %v1134_v54 = vld [vmem:[%s1858_s6 + $0x30] sm:$0xff] }
 0x38e   :  { %v1205_v3 = vpop.f32.mrb[4].mxu0 }
 0x38f   :  { %v309_v5 = vpop.f32.mrb[5].mxu0  ;;  %v315_v7 = vadd.f32 %v1205_v3, %v79_v4 }
 0x390   :  { %v310_v6 = vadd.f32 %v309_v5, %v78_v2  ;;  %v429_v5 = vld [vmem:[%s1858_s6 + $0x8] sm:$0xff] }
 0x391   :  { %v322_v9 = vsel %vm318_vm2, %v315_v7, -inf }
 0x392   :  { %v319_v8 = vsel %vm318_vm2, %v310_v6, -inf }
 0x393   :  { %320 = vmax.xlane.f32.xlu1 %v319_v8  ;;  %v431_v8 = vld [vmem:[%s1858_s6 + $0x18] sm:$0xff] }
 0x397   :  { %323 = vmax.xlane.f32.xlu1 %v322_v9 }
 0x420   :  { %v321_v10 = vpop.xlane.xlu1 %320 }
 0x421   :  { %v325_v11 = vsub.f32 %v310_v6, %v321_v10 }
 0x423   :  { %v327_v14 = vmul.f32 1.442695, %v325_v11 }
 0x424   :  { %v324_v12 = vpop.xlane.xlu1 %323 }
 0x425   :  { %v326_v13 = vsub.f32 %v315_v7, %v324_v12  ;;  %v430_v7 = vld [vmem:[%s1858_s6 + $0x10] sm:$0xff]  ;;  %v1140_v12 = vld [vmem:[%s1859_s7] ss:$0 sm:$0xff] }
 0x426   :  { %v1335_v11 = vpack.c.bf16 %v431_v8, %v430_v7  ;;  %v1008_v7 = vld [vmem:[%s1864_s12 + $0x60] sm:$0xff]  ;;  %v1009_v8 = vld [vmem:[%s1864_s12 + $0x68] sm:$0xff] }
 0x427   :  { %v329_v15 = vmul.f32 1.442695, %v326_v13 }
 0x429   :  { %1410 = vpow2.f32 %v329_v15 }
 0x42a   :  { %1412 = vpow2.f32 %v327_v14 }
 0x433   :  { %v1411_v16 = vpop.eup %1410 }
 0x434   :  { %v334_v17 = vsel %vm318_vm2, %v1411_v16, 0.0  ;;  %v1413_v18 = vpop.eup %1412 }
 0x435   :  { %335 = vadd.xlane.f32.xlu1 %v334_v17  ;;  %v331_v19 = vsel %vm318_vm2, %v1413_v18, 0.0 }
 0x439   :  { %332 = vadd.xlane.f32.xlu1 %v331_v19 }
 0x44a   :  { %1397 = vrot.lane.b32.xlu1 %v1391_v58, %s1517_s27  ;;  %v1135_v58 = vld [vmem:[%s1858_s6 + $0x38] sm:$0xff] }
 0x4c2   :  { %v336_v20 = vpop.xlane.xlu1 %335 }
 0x4c3   :  { %1414 = vrcp.f32 %v336_v20 }
 0x4c6   :  { %v333_v21 = vpop.xlane.xlu1 %332 }
 0x4c7   :  { %1416 = vrcp.f32 %v333_v21 }
 0x4ca   :  { %v1398_v22 = vpop.permute.xlu1 %1397 }
 0x4cb   :  { %v1400_v23 = vunpack.i.h.bf16 %v1398_v22  ;;  %v1399_v24 = vunpack.i.l.bf16 %v1398_v22 }
 0x4cd   :  { %v1309_v25 = vpack.c.bf16 %v1400_v23, %v1399_v24  ;;  %v1415_v26 = vpop.eup %1414 }
 0x4ce   :  { %v340_v29 = vmul.f32 %v1415_v26, %v1411_v16 }
 0x4cf   :  { %1310 = vmatprep.subr.bf16.mxu0 %v1309_v25 }
 0x4d0   :  { %1312 = vmatpush3.bf16.msra.mxu0 %v1309_v25 }
 0x4d1   :  { %v1417_v27 = vpop.eup %1416  ;;  %1315 = vmatprep.subr.msk.bf16.mxu0 %vm1682_vm1, %v1313_v60 }
 0x4d2   :  { %v339_v28 = vmul.f32 %v1417_v27, %v1413_v18 }
 0x4d4   :  { %1210 = vmatprep.mubr.msk.f32.mxu0 %vm318_vm2, %v339_v28 }
 0x4d5   :  { %1211 = vmatmul.mubr.msk.f32.vlgmr.msra.gmra.mrb[6].mxu0 %vm318_vm2, %v340_v29 }
 0x4d6   :  { %1217 = vmatprep.mubr.msk.f32.mxu0 %vm82_vm0, %v433_v30  ;;  %v853_v30 = vld [vmem:[%s1862_s10 + $0x8] sm:$0xff] }
 0x4d9   :  { %1318 = vmatpush3.bf16.xpose.msk.msra.mxu0 %vm1682_vm1, %v1313_v60  ;;  %v1327_v60 = vpack.c.bf16 %v1135_v58, %v1134_v54  ;;  %v997_v54 = vld [vmem:[%s1864_s12 + $0x8] sm:$0xff]  ;;  %v998_v58 = vld [vmem:[%s1864_s12 + $0x10] sm:$0xff] }
 0x4da   :  { %1324 = vmatprep.subr.bf16.mxu0 %v1323_v55 }
 0x4e0   :  { %1218 = vmatmul.mubr.msk.f32.vlgmr.msra.gmra.mrb[8].mxu0 %vm82_vm0, %v435_v31 }
 0x4e1   :  { %1326 = vmatpush3.bf16.msra.mxu0 %v1323_v55  ;;  %v1347_v55 = vpack.c.bf16 %v997_v54, %v996_v53 }
 0x4e2   :  { %1328 = vmatprep.subr.bf16.mxu0 %v1327_v60 }
 0x4e5   :  { %1330 = vmatpush3.bf16.msra.mxu0 %v1327_v60  ;;  %v999_v60 = vld [vmem:[%s1864_s12 + $0x18] sm:$0xff] }
 0x5a8   :  { %v1703_v32 = vpop.f32.mrb[6].mxu0 }
 0x5a9   :  { %v419_v33 = vpop.f32.mrb[7].mxu0 }
 0x5b3   :  { %v1219_v34 = vpop.f32.mrb[8].mxu0 }
 0x5b4   :  { %v518_v35 = vadd.f32 %v1219_v34, %v79_v4  ;;  %v512_v36 = vpop.f32.mrb[9].mxu0  ;;  %v428_v4 = vld [vmem:[%s1858_s6] sm:$0xff] }
 0x5b5   :  { %v513_v37 = vadd.f32 %v512_v36, %v78_v2  ;;  %v1331_v6 = vpack.c.bf16 %v429_v5, %v428_v4  ;;  %v1006_v4 = vld [vmem:[%s1864_s12 + $0x50] sm:$0xff]  ;;  %v1007_v5 = vld [vmem:[%s1864_s12 + $0x58] sm:$0xff] }
 0x5b6   :  { %v524_v38 = vsel %vm318_vm2, %v518_v35, -inf }
 0x5b7   :  { %525 = vmax.xlane.f32.xlu1 %v524_v38  ;;  %v521_v40 = vsel %vm318_vm2, %v513_v37, -inf  ;;  %1332 = vmatprep.subr.bf16.mxu0 %v1331_v6 }
 0x5b8   :  { %522 = vmax.xlane.f32.xlu0 %v521_v40 }
 0x644   :  { %v526_v41 = vpop.xlane.xlu1 %525 }
 0x645   :  { %v528_v43 = vsub.f32 %v518_v35, %v526_v41  ;;  %v523_v44 = vpop.xlane.xlu0 %522 }
 0x646   :  { %v527_v45 = vsub.f32 %v513_v37, %v523_v44  ;;  %v1141_v44 = vld [vmem:[%s1860_s8] ss:$0 sm:$0xff] }
 0x647   :  { %v531_v46 = vmul.f32 1.442695, %v528_v43 }
 0x648   :  { %v529_v47 = vmul.f32 1.442695, %v527_v45 }
 0x649   :  { %1418 = vpow2.f32 %v531_v46  ;;  %v1142_v46 = vld [vmem:[%s1861_s9] ss:$0 sm:$0xff] }
 0x64a   :  { %1420 = vpow2.f32 %v529_v47 }
 0x653   :  { %v1419_v48 = vpop.eup %1418 }
 0x654   :  { %v536_v49 = vsel %vm318_vm2, %v1419_v48, 0.0  ;;  %v1421_v50 = vpop.eup %1420 }
 0x655   :  { %537 = vadd.xlane.f32.xlu0 %v536_v49  ;;  %v533_v51 = vsel %vm318_vm2, %v1421_v50, 0.0 }
 0x659   :  { %534 = vadd.xlane.f32.xlu0 %v533_v51 }
 0x66f   :  { %1402 = vrot.lane.b32.xlu0 %v1401_v59, %s1515_s5 }
 0x6e2   :  { %v538_v56 = vpop.xlane.xlu0 %537 }
 0x6e3   :  { %1422 = vrcp.f32 %v538_v56  ;;  %v1351_v56 = vpack.c.bf16 %v999_v60, %v998_v58 }
 0x6e6   :  { %v535_v57 = vpop.xlane.xlu0 %534 }
 0x6e7   :  { %1424 = vrcp.f32 %v535_v57  ;;  %v1000_v57 = vld [vmem:[%s1864_s12 + $0x20] sm:$0xff] }
 0x6ea   :  { %v1403_v59 = vpop.permute.xlu0 %1402 }
 0x6eb   :  { %v1405_v61 = vunpack.i.h.bf16 %v1403_v59  ;;  %v1404_v62 = vunpack.i.l.bf16 %v1403_v59  ;;  %v1001_v59 = vld [vmem:[%s1864_s12 + $0x28] sm:$0xff] }
 0x6ed   :  { %v1319_v63 = vpack.c.bf16 %v1405_v61, %v1404_v62  ;;  %v1423_v0 = vpop.eup %1422  ;;  %v1355_v61 = vpack.c.bf16 %v1001_v59, %v1000_v57  ;;  %v1002_v62 = vld [vmem:[%s1864_s12 + $0x30] sm:$0xff]  ;;  %v1518_v57 = vmov -1.0  }
 0x6ee   :  { %v542_v3 = vmul.f32 %v1423_v0, %v1419_v48 }
 0x6ef   :  { %1320 = vmatprep.subr.bf16.mxu1 %v1319_v63 }
 0x6f0   :  { %1322 = vmatpush3.bf16.msra.mxu1 %v1319_v63  ;;  %v1003_v63 = vld [vmem:[%s1864_s12 + $0x38] sm:$0xff] }
 0x6f1   :  { %v1425_v1 = vpop.eup %1424  ;;  %v1359_v0 = vpack.c.bf16 %v1003_v63, %v1002_v62 }
 0x6f2   :  { %v541_v2 = vmul.f32 %v1425_v1, %v1421_v50  ;;  %v1004_v1 = vld [vmem:[%s1864_s12 + $0x40] sm:$0xff] }
 0x6f4   :  { %1224 = vmatprep.mubr.msk.f32.mxu1 %vm318_vm2, %v541_v2  ;;  %v1005_v2 = vld [vmem:[%s1864_s12 + $0x48] sm:$0xff] }
 0x6f5   :  { %1225 = vmatmul.mubr.msk.f32.vlgmr.msra.gmra.mrb[0].mxu1 %vm318_vm2, %v542_v3  ;;  %v1363_v3 = vpack.c.bf16 %v1005_v2, %v1004_v1 }
 0x7c8   :  { %v1226_v9 = vpop.f32.mrb[0].mxu1 }
 0x7c9   :  { %v621_v10 = vpop.f32.mrb[1].mxu1 }
 0x7ca   :  { %1235 = vmatprep.mubr.msk.f32.mxu0 %vm82_vm0, %v621_v10  ;;  %v1010_v10 = vld [vmem:[%s1864_s12 + $0x70] sm:$0xff] }
 0x7cb   :  { %1236 = vmatmul.mubr.msk.f32.vlgmr.msra.gmra.mrb[10].mxu0 %vm82_vm0, %v1226_v9  ;;  %v1371_v9 = vpack.c.bf16 %v1009_v8, %v1008_v7  ;;  %v1146_v7 = vld [vmem:[%s1865_s13] ss:$0 sm:$0xff] }
 0x7cc   :  { %1334 = vmatpush3.bf16.msra.mxu0 %v1331_v6  ;;  %1246 = vmatprep.mubr.msk.f32.mxu0 %vm82_vm0, %v419_v33  ;;  %v855_v33 = vld [vmem:[%s1862_s10 + $0x18] sm:$0xff]  ;;  %v1367_v6 = vpack.c.bf16 %v1007_v5, %v1006_v4 }
 0x7cd   :  { %1336 = vmatprep.subr.bf16.mxu0 %v1335_v11 }
 0x7d0   :  { %1338 = vmatpush3.bf16.msra.mxu0 %v1335_v11  ;;  %v1011_v11 = vld [vmem:[%s1864_s12 + $0x78] sm:$0xff] }
 0x7d3   :  { %1247 = vmatmul.mubr.msk.f32.vlgmr.msra.gmra.mrb[10].mxu0 %vm82_vm0, %v1703_v32  ;;  %v854_v32 = vld [vmem:[%s1862_s10 + $0x10] sm:$0xff] }
 0x7d4   :  { %v1343_v34 = vpack.c.bf16 %v855_v33, %v854_v32 }
 0x8a6   :  { %v1248_v13 = vpop.f32.mrb[10].mxu0 }
 0x8a7   :  { %v788_v14 = vpop.f32.mrb[11].mxu0  ;;  %v805_v15 = vadd.f32 %v1248_v13, %v1140_v12  ;;  %v1143_v13 = vld [vmem:[%s1863_s11] ss:$0 sm:$0xff] }
 0x8a8   :  { %v804_v16 = vadd.f32 %v1140_v12, %v788_v14  ;;  %v1375_v12 = vpack.c.bf16 %v1011_v11, %v1010_v10 }
 0x8a9   :  { %v807_v19 = vadd.f32 %v805_v15, %v1663_v42  ;;  %v852_v42 = vld [vmem:[%s1862_s10] sm:$0xff] }
 0x8aa   :  { %v806_v17 = vadd.f32 %v804_v16, %v1659_v39  ;;  %v1339_v31 = vpack.c.bf16 %v853_v30, %v852_v42 }
 0x8ab   :  { %v813_v20 = vsel %vm82_vm0, %v807_v19, 0.0 }
 0x8ac   :  { %v810_v18 = vsel %vm82_vm0, %v806_v17, 0.0  ;;  %1340 = vmatprep.subr.bf16.mxu1 %v1339_v31 }
 0x8ad   :  { %811 = vadd.xlane.f32.xlu1 %v810_v18  ;;  %1342 = vmatpush3.bf16.msra.mxu1 %v1339_v31 }
 0x8ae   :  { %1344 = vmatprep.subr.bf16.mxu1 %v1343_v34 }
 0x8b1   :  { %814 = vadd.xlane.f32.xlu1 %v813_v20  ;;  %1346 = vmatpush3.bf16.msra.mxu1 %v1343_v34 }
 0x8b2   :  { %1348 = vmatprep.subr.bf16.mxu1 %v1347_v55 }
 0x93a   :  { %v812_v21 = vpop.xlane.xlu1 %811 }
 0x93b   :  { %v816_v22 = vmul.f32 0.03125, %v812_v21 }
 0x93d   :  { %v818_v23 = vsub.f32 %v806_v17, %v816_v22 }
 0x93e   :  { %v815_v24 = vpop.xlane.xlu1 %814 }
 0x93f   :  { %v817_v25 = vmul.f32 0.03125, %v815_v24  ;;  %v820_v26 = vmul.f32 %v818_v23, %v818_v23 }
 0x941   :  { %v819_v27 = vsub.f32 %v807_v19, %v817_v25  ;;  %v822_v28 = vsel %vm82_vm0, %v820_v26, 0.0 }
 0x942   :  { %823 = vadd.xlane.f32.xlu1 %v822_v28 }
 0x943   :  { %v821_v29 = vmul.f32 %v819_v27, %v819_v27 }
 0x945   :  { %v825_v39 = vsel %vm82_vm0, %v821_v29, 0.0 }
 0x946   :  { %826 = vadd.xlane.f32.xlu1 %v825_v39 }
 0x9cf   :  { %v824_v35 = vpop.xlane.xlu1 %823 }
 0x9d0   :  { %v828_v36 = vmul.f32 0.03125, %v824_v35 }
 0x9d2   :  { %v830_v37 = vadd.f32 1e-05, %v828_v36 }
 0x9d3   :  { %v827_v38 = vpop.xlane.xlu1 %826 }
 0x9d4   :  { %1426 = vrsqrt.f32 %v830_v37  ;;  %v829_v40 = vmul.f32 0.03125, %v827_v38 }
 0x9d6   :  { %v831_v41 = vadd.f32 1e-05, %v829_v40 }
 0x9d8   :  { %1428 = vrsqrt.f32 %v831_v41 }
 0x9de   :  { %v1427_v43 = vpop.eup %1426 }
 0x9df   :  { %v834_v45 = vmul.f32 %v1427_v43, %v818_v23 }
 0x9e1   :  { %v842_v47 = vmul.f32 %v1141_v44, %v834_v45 }
 0x9e2   :  { %v1429_v48 = vpop.eup %1428 }
 0x9e3   :  { %v835_v49 = vmul.f32 %v1429_v48, %v819_v27  ;;  %v1771_v50 = vadd.f32 %v1142_v46, %v842_v47 }
 0x9e5   :  { %v843_v51 = vmul.f32 %v1141_v44, %v835_v49  ;;  %1257 = vmatprep.mubr.msk.f32.mxu1 %vm82_vm0, %v1771_v50 }
 0x9e7   :  { %v1775_v52 = vadd.f32 %v1142_v46, %v843_v51 }
 0x9e9   :  { %1258 = vmatmul.mubr.msk.f32.vlgmr.msra.gmra.mrb[2].mxu1 %vm82_vm0, %v1775_v52 }
 0x9ea   :  { %1350 = vmatpush3.bf16.msra.mxu1 %v1347_v55 }
 0x9eb   :  { %1352 = vmatprep.subr.bf16.mxu1 %v1351_v56 }
 0x9ee   :  { %1354 = vmatpush3.bf16.msra.mxu1 %v1351_v56 }
 0x9ef   :  { %1356 = vmatprep.subr.bf16.mxu1 %v1355_v61 }
 0x9f2   :  { %1358 = vmatpush3.bf16.msra.mxu1 %v1355_v61 }
 0x9f3   :  { %1360 = vmatprep.subr.bf16.mxu1 %v1359_v0 }
 0x9f6   :  { %1362 = vmatpush3.bf16.msra.mxu1 %v1359_v0 }
 0x9f7   :  { %1364 = vmatprep.subr.bf16.mxu1 %v1363_v3 }
 0x9fa   :  { %1366 = vmatpush3.bf16.msra.mxu1 %v1363_v3 }
 0x9fb   :  { %1368 = vmatprep.subr.bf16.mxu1 %v1367_v6 }
 0x9fe   :  { %1370 = vmatpush3.bf16.msra.mxu1 %v1367_v6 }
 0x9ff   :  { %1372 = vmatprep.subr.bf16.mxu1 %v1371_v9 }
 0xa02   :  { %1374 = vmatpush3.bf16.msra.mxu1 %v1371_v9 }
 0xa03   :  { %1376 = vmatprep.subr.bf16.mxu1 %v1375_v12 }
 0xa06   :  { %1378 = vmatpush3.bf16.msra.mxu1 %v1375_v12 }
 0xabc   :  { %v1259_v14 = vpop.f32.mrb[2].mxu1 }
 0xabd   :  { %v941_v15 = vadd.f32 %v1259_v14, %v1143_v13  ;;  %v935_v16 = vpop.f32.mrb[3].mxu1 }
 0xabe   :  { %v936_v17 = vadd.f32 %v1143_v13, %v935_v16 }
 0xabf   :  { %v947_v18 = vmul.f32 0.70710677, %v941_v15  ;;  %v945_v4 = vmul.f32 0.5, %v941_v15 }
 0xac0   :  { %v946_v19 = vmul.f32 0.70710677, %v936_v17  ;;  %v944_v2 = vmul.f32 0.5, %v936_v17 }
 0xac1   :  { %v953_v20 = vand.u32 2147483647, %v947_v18  ;;  %vm949_vm3 = vcmp.ge.f32.partialorder %v947_v18, 0.0 }
 0xac2   :  { %v952_v21 = vand.u32 2147483647, %v946_v19  ;;  %vm948_vm4 = vcmp.ge.f32.partialorder %v946_v19, 0.0  ;;  %v951_v59 = vsel %vm949_vm3, 1.0, %v1518_v57 }
 0xac3   :  { %v955_v22 = vmul.f32 0.3275911, %v953_v20  ;;  %v979_v26 = vsub.f32 0.0, %v953_v20  ;;  %v950_v63 = vsel %vm948_vm4, 1.0, %v1518_v57 }
 0xac4   :  { %v954_v23 = vmul.f32 0.3275911, %v952_v21  ;;  %v978_v27 = vsub.f32 0.0, %v952_v21 }
 0xac5   :  { %v957_v24 = vadd.f32 1.0, %v955_v22  ;;  %v981_v29 = vmul.f32 %v979_v26, %v953_v20 }
 0xac6   :  { %v956_v25 = vadd.f32 1.0, %v954_v23  ;;  %v980_v30 = vmul.f32 %v978_v27, %v952_v21 }
 0xac7   :  { %1430 = vrcp.f32 %v957_v24  ;;  %v984_v33 = vmul.f32 1.442695, %v981_v29 }
 0xac8   :  { %1432 = vrcp.f32 %v956_v25  ;;  %v982_v36 = vmul.f32 1.442695, %v980_v30 }
 0xac9   :  { %1434 = vpow2.f32 %v984_v33 }
 0xaca   :  { %1436 = vpow2.f32 %v982_v36 }
 0xad1   :  { %v1431_v28 = vpop.eup %1430 }
 0xad2   :  { %v1433_v39 = vpop.eup %1432  ;;  %v961_v42 = vmul.f32 1.0614054, %v1431_v28 }
 0xad3   :  { %v960_v31 = vmul.f32 1.0614054, %v1433_v39  ;;  %v1435_v53 = vpop.eup %1434 }
 0xad4   :  { %v963_v32 = vadd.f32 -1.4531521, %v961_v42  ;;  %v1437_v55 = vpop.eup %1436 }
 0xad5   :  { %v962_v34 = vadd.f32 -1.4531521, %v960_v31 }
 0xad6   :  { %v965_v35 = vmul.f32 %v1431_v28, %v963_v32 }
 0xad7   :  { %v964_v37 = vmul.f32 %v1433_v39, %v962_v34 }
 0xad8   :  { %v967_v38 = vadd.f32 1.4214138, %v965_v35 }
 0xad9   :  { %v966_v40 = vadd.f32 1.4214138, %v964_v37 }
 0xada   :  { %v969_v41 = vmul.f32 %v1431_v28, %v967_v38 }
 0xadb   :  { %v968_v43 = vmul.f32 %v1433_v39, %v966_v40 }
 0xadc   :  { %v971_v44 = vadd.f32 -0.28449672, %v969_v41 }
 0xadd   :  { %v970_v45 = vadd.f32 -0.28449672, %v968_v43 }
 0xade   :  { %v973_v46 = vmul.f32 %v1431_v28, %v971_v44 }
 0xadf   :  { %v972_v47 = vmul.f32 %v1433_v39, %v970_v45 }
 0xae0   :  { %v975_v48 = vadd.f32 0.2548296, %v973_v46 }
 0xae1   :  { %v974_v49 = vadd.f32 0.2548296, %v972_v47 }
 0xae2   :  { %v977_v51 = vmul.f32 %v1431_v28, %v975_v48 }
 0xae3   :  { %v976_v54 = vmul.f32 %v1433_v39, %v974_v49 }
 0xae4   :  { %v987_v58 = vmul.f32 %v1435_v53, %v977_v51 }
 0xae5   :  { %v986_v60 = vmul.f32 %v1437_v55, %v976_v54 }
 0xae6   :  { %v989_v56 = vsub.f32 1.0, %v987_v58 }
 0xae7   :  { %v988_v61 = vsub.f32 1.0, %v986_v60 }
 0xae8   :  { %v991_v62 = vmul.f32 %v989_v56, %v951_v59 }
 0xae9   :  { %v990_v0 = vmul.f32 %v988_v61, %v950_v63 }
 0xaea   :  { %v993_v1 = vadd.f32 1.0, %v991_v62 }
 0xaeb   :  { %v992_v3 = vadd.f32 1.0, %v990_v0 }
 0xaec   :  { %v995_v6 = vmul.f32 %v993_v1, %v945_v4 }
 0xaed   :  { %v994_v5 = vmul.f32 %v992_v3, %v944_v2 }
 0xaef   :  { %1292 = vmatprep.mubr.f32.mxu1 %v994_v5 }
 0xaf0   :  { %1293 = vmatmul.mubr.f32.vlgmr.msra.gmra.mrb[4].mxu1 %v995_v6 }
 0xbc3   :  { %v1294_v8 = vpop.f32.mrb[4].mxu1 }
 0xbc4   :  { %v1091_v9 = vadd.f32 %v1294_v8, %v1146_v7  ;;  %v1085_v10 = vpop.f32.mrb[5].mxu1 }
 0xbc5   :  { %v1086_v11 = vadd.f32 %v1146_v7, %v1085_v10 }
 0xbc6   :  { %v1095_v12 = vadd.f32 %v1091_v9, %v1775_v52 }
 0xbc7   :  { %v1094_v13 = vadd.f32 %v1086_v11, %v1771_v50 }
 0xbc8   :  { %1097 = vst.msk [vmem:[#allocation7 + $0x8] sm:$0xff] %vm82_vm0, %v1095_v12 }
 0xbc9   :  { %1096 = vst.msk [vmem:[#allocation7] sm:$0xff] %vm82_vm0, %v1094_v13 }
 0xbca   :  { %1493 = shalt.err (!%p1490_p6)
}
 0xbcb   :  { %s1494_s6 = scalar_lea.hbm %s1866_s14, 256 }
 0xbcc   :  { %p1495_p7 = scmp.ne.s32.totalorder %s1866_s14, %s1494_s6  ;;  %p1498_p8 = scmp.lt.u32.totalorder %s1494_s6, %s1866_s14 }
 0xbce   :  { %p1500_p9 = pnand %p1498_p8, %p1495_p7 }
 0xbd0   :  { %1503 = shalt.err (!%p1500_p9)
}
 0xbd1   :  { %1109 = dma.vmem_to_hbm [thread:$0]  %s1104_s2, 256, %s1866_s14, [#allocation4], %s1511_s23, %s1511_s23, %s1512_s24  }
 0xbd2   :  { %1508 = dma.done.wait [#allocation4], 256  }
 0xbd3   :  { %1509 = vsyncadd [#allocation4], 4294967040 }
 0xbd4   :  { %1113 = vsyncpa [#allocation3], 1 }
 0xbd5   :  { %1114 = vsyncpa [#allocation6], 1 }
 0xbd6   :  { %1115 = vsyncpa [#allocation4], 1 }

</bundles_post_ra>
